<compile_context>
chip_gen: v7x
topology: tpu7x:2x2x1
jax: 0.10.0
libtpu: 0.0.40
codegen_flags: <defaults>
</compile_context>

<pallas_src>
import math

import jax
import jax.numpy as jnp
from jax.experimental import pallas as pl
from jax.experimental.pallas import tpu as pltpu


def _rope_kernel(pos_ref, inv_ref, phase_ref, out_ref):
    # pos_ref:   (1, tR, k)  f32 -- k consecutive positions folded per lane-row
    # inv_ref:   (1, L)      f32 -- inv_freq interleaved/duplicated per lane
    # phase_ref: (1, L)      f32 -- 0 on cos lanes, pi/2 on sin lanes
    # out_ref:   (1, tR, L)  x.dtype -- interleaved [cos, sin] pairs
    tR, k = pos_ref.shape[1], pos_ref.shape[2]
    L = inv_ref.shape[1]
    two_h = L // k

    pos = pos_ref[0]                                           # (tR, k) f32
    # Expand positions across lanes: lane j belongs to position column j // two_h.
    cols = [jnp.broadcast_to(pos[:, i:i + 1], (tR, two_h)) for i in range(k)]
    pos_lane = cols[0] if k == 1 else jnp.concatenate(cols, axis=1)   # (tR, L)

    # angle = pos * inv_freq; even lanes -> cos(angle), odd lanes -> sin(angle)
    # via the phase trick sin(x) = cos(x - pi/2): one transcendental per output.
    angles = pos_lane * inv_ref[...] - phase_ref[...]          # (tR, L) f32
    out_ref[0] = jnp.cos(angles).astype(out_ref.dtype)


def _pick_row_tile(R, target):
    """Row tile that divides R (multiple of 8 unless it is the full extent).
    Returns (tile, padded_R); padded_R > R only in the no-nice-divisor fallback."""
    target = max(8, (target // 8) * 8)
    if R <= target:
        return R, R
    for t in range(target, 7, -8):
        if R % t == 0:
            return t, R
    Rp = ((R + target - 1) // target) * target
    return target, Rp


def rotary_embedding_forward(x, position_ids, *, d_head, base=10000.0,
                             seq_row_tile=512, min_pallas_elements=1 << 16):
    """Pallas equivalent of RotaryEmbedding.forward (use_xpos=False path).

    Returns (output, pos_emb):
      output  = x (or x[..., None] if x.ndim == 2), untouched
      pos_emb = (B, S, d_head//2, 2) of dtype x.dtype; [..., 0]=cos, [..., 1]=sin
    """
    assert d_head % 2 == 0
    B, S = position_ids.shape
    H = d_head // 2
    two_h = d_head  # 2 * H

    # Tiny problems: per-grid-step + launch overhead dominates, use plain XLA.
    if B * S * d_head < min_pallas_elements:
        return _reference(x, position_ids, d_head=d_head, base=base)

    # Same "parameter" as the module buffer: inv_freq = base**(-arange(0,d,2)/d)
    inv_freq = 1.0 / (base ** (jnp.arange(0, d_head, 2, dtype=jnp.float32) / d_head))

    # Lane folding: pack k consecutive positions into one 128-wide lane row.
    if two_h < 128 and 128 % two_h == 0 and S % (128 // two_h) == 0:
        k = 128 // two_h
    else:
        k = 1
    L = k * two_h            # lane width of one output row
    R = S // k               # folded row count

    # Per-lane constants (f32, exact same inv_freq values as the module):
    # lane j -> inv_freq[(j % two_h) // 2]; phase 0 for even (cos), pi/2 for odd (sin).
    inv_lane = jnp.tile(jnp.repeat(inv_freq, 2), k)[None, :]                      # (1, L)
    lane = jnp.arange(L, dtype=jnp.int32)
    phase_lane = ((lane % 2).astype(jnp.float32) * jnp.float32(math.pi / 2))[None, :]

    tR, Rp = _pick_row_tile(R, seq_row_tile)
    pos_f32 = position_ids.astype(jnp.float32).reshape(B, R, k)
    if Rp != R:
        pos_f32 = jnp.pad(pos_f32, ((0, 0), (0, Rp - R), (0, 0)))

    grid = (B, Rp // tR)
    out = pl.pallas_call(
        _rope_kernel,
        grid=grid,
        in_specs=[
            pl.BlockSpec((1, tR, k), lambda b, r: (b, r, 0)),   # folded positions
            pl.BlockSpec((1, L), lambda b, r: (0, 0)),          # shared inv_freq lanes
            pl.BlockSpec((1, L), lambda b, r: (0, 0)),          # shared phase lanes
        ],
        out_specs=pl.BlockSpec((1, tR, L), lambda b, r: (b, r, 0)),
        out_shape=jax.ShapeDtypeStruct((B, Rp, L), x.dtype),
        compiler_params=pltpu.CompilerParams(
            dimension_semantics=("parallel", "parallel")),
    )(pos_f32, inv_lane, phase_lane)

    if Rp != R:
        out = out[:, :R, :]
    # (B, R, k*2H) has exactly the memory layout of stack([cos, sin], -1):
    pos_emb = out.reshape(B, S, H, 2)
    output = x[..., None] if x.ndim == 2 else x
    return output, pos_emb


def _reference(x, position_ids, *, d_head, base=10000.0):
    """Pure-JAX reference mirroring the PyTorch module."""
    inv_freq = 1.0 / (base ** (jnp.arange(0, d_head, 2, dtype=jnp.float32) / d_head))
    freqs = position_ids.astype(jnp.float32)[:, :, None] * inv_freq[None, None, :]
    cos = jnp.cos(freqs).astype(x.dtype)
    sin = jnp.sin(freqs).astype(x.dtype)
    pos_emb = jnp.stack([cos, sin], axis=-1)
    output = x[..., None] if x.ndim == 2 else x
    return output, pos_emb


if __name__ == "__main__":
    root = jax.random.PRNGKey(0)

    def run_case(key, B, S, d_head, dtype, seq_row_tile=512, atol=1e-4, arange_pos=False):
        kx, kp = jax.random.split(key)
        x = jax.random.normal(kx, (B, S, d_head), dtype=dtype)
        if arange_pos:
            position_ids = jnp.broadcast_to(jnp.arange(S, dtype=jnp.int32)[None, :], (B, S))
        else:
            position_ids = jax.random.randint(kp, (B, S), 0, S).astype(jnp.int32)

        out, pos_emb = rotary_embedding_forward(
            x, position_ids, d_head=d_head,
            seq_row_tile=seq_row_tile, min_pallas_elements=0)  # force Pallas path
        out = jax.block_until_ready(out)
        pos_emb = jax.block_until_ready(pos_emb)

        ref_out, ref_pe = _reference(x, position_ids, d_head=d_head)
        assert out.shape == ref_out.shape
        assert pos_emb.shape == (B, S, d_head // 2, 2)
        assert pos_emb.dtype == x.dtype
        assert jnp.allclose(out.astype(jnp.float32), ref_out.astype(jnp.float32))
        assert jnp.allclose(pos_emb.astype(jnp.float32), ref_pe.astype(jnp.float32),
                            atol=atol, rtol=1e-4)

    k0, k1, k2 = jax.random.split(root, 3)
    # small canonical shape (k=4 lane folding, single row-tile)
    run_case(k0, B=2, S=8, d_head=32, dtype=jnp.float32, atol=1e-5, arange_pos=True)
    # k=2 lane folding, larger positions
    run_case(k1, B=2, S=256, d_head=64, dtype=jnp.float32, atol=5e-4)
    # bf16 output cast + multi-tile row grid (seq_row_tile=64 -> grid (2, 2))
    run_case(k2, B=2, S=256, d_head=64, dtype=jnp.bfloat16, seq_row_tile=64, atol=1e-2)

    print("KERNEL_OK")
</pallas_src>

<mosaic_0001>
module attributes {stable_mosaic.version = 11 : i64} {
  func.func @_rope_kernel(%arg0: i32, %arg1: i32, %arg2: memref<1x2x4xf32, #tpu.memory_space<vmem>>, %arg3: memref<1x128xf32, #tpu.memory_space<vmem>>, %arg4: memref<1x128xf32, #tpu.memory_space<vmem>>, %arg5: memref<1x2x128xf32, #tpu.memory_space<vmem>>) attributes {dimension_semantics = [#tpu.dimension_semantics<parallel>, #tpu.dimension_semantics<parallel>], iteration_bounds = array<i64: 2, 1>, scalar_prefetch = 0 : i64, scratch_operands = 0 : i64, tpu.core_type = #tpu.core_type<tc>, window_params = [{transform_indices = @transform_0, window_bounds = array<i64: 1, 2, 4>}, {pipeline_mode = #tpu.pipeline_mode<synchronous>, transform_indices = @transform_1, window_bounds = array<i64: 1, 128>}, {pipeline_mode = #tpu.pipeline_mode<synchronous>, transform_indices = @transform_2, window_bounds = array<i64: 1, 128>}, {transform_indices = @transform_3, window_bounds = array<i64: 1, 2, 128>}]} {
    %c0 = arith.constant 0 : index
    %c0_0 = arith.constant 0 : index
    %c0_1 = arith.constant 0 : index
    %0 = vector.load %arg2[%c0, %c0_0, %c0_1] : memref<1x2x4xf32, #tpu.memory_space<vmem>>, vector<1x2x4xf32>
    %1 = vector.shape_cast %0 : vector<1x2x4xf32> to vector<2x4xf32>
    %2 = vector.extract_strided_slice %1 {offsets = [0, 0], sizes = [2, 1], strides = [1, 1]} : vector<2x4xf32> to vector<2x1xf32>
    %3 = vector.shape_cast %2 : vector<2x1xf32> to vector<2x1xf32>
    %4 = vector.broadcast %3 : vector<2x1xf32> to vector<2x32xf32>
    %5 = vector.extract_strided_slice %1 {offsets = [0, 1], sizes = [2, 1], strides = [1, 1]} : vector<2x4xf32> to vector<2x1xf32>
    %6 = vector.shape_cast %5 : vector<2x1xf32> to vector<2x1xf32>
    %7 = vector.broadcast %6 : vector<2x1xf32> to vector<2x32xf32>
    %8 = vector.extract_strided_slice %1 {offsets = [0, 2], sizes = [2, 1], strides = [1, 1]} : vector<2x4xf32> to vector<2x1xf32>
    %9 = vector.shape_cast %8 : vector<2x1xf32> to vector<2x1xf32>
    %10 = vector.broadcast %9 : vector<2x1xf32> to vector<2x32xf32>
    %11 = vector.extract_strided_slice %1 {offsets = [0, 3], sizes = [2, 1], strides = [1, 1]} : vector<2x4xf32> to vector<2x1xf32>
    %12 = vector.shape_cast %11 : vector<2x1xf32> to vector<2x1xf32>
    %13 = vector.broadcast %12 : vector<2x1xf32> to vector<2x32xf32>
    %14 = tpu.concatenate %4, %7, %10, %13 in 1 : vector<2x32xf32>, vector<2x32xf32>, vector<2x32xf32>, vector<2x32xf32> -> vector<2x128xf32>
    %c0_2 = arith.constant 0 : index
    %c0_3 = arith.constant 0 : index
    %15 = vector.load %arg3[%c0_2, %c0_3] : memref<1x128xf32, #tpu.memory_space<vmem>>, vector<1x128xf32>
    %16 = vector.broadcast %15 : vector<1x128xf32> to vector<2x128xf32>
    %17 = arith.mulf %14, %16 : vector<2x128xf32>
    %c0_4 = arith.constant 0 : index
    %c0_5 = arith.constant 0 : index
    %18 = vector.load %arg4[%c0_4, %c0_5] : memref<1x128xf32, #tpu.memory_space<vmem>>, vector<1x128xf32>
    %19 = vector.broadcast %18 : vector<1x128xf32> to vector<2x128xf32>
    %20 = arith.subf %17, %19 : vector<2x128xf32>
    %21 = math.cos %20 : vector<2x128xf32>
    %c0_6 = arith.constant 0 : index
    %c0_7 = arith.constant 0 : index
    %c0_8 = arith.constant 0 : index
    %22 = vector.load %arg5[%c0_6, %c0_7, %c0_8] : memref<1x2x128xf32, #tpu.memory_space<vmem>>, vector<1x2x128xf32>
    %23 = vector.shape_cast %22 : vector<1x2x128xf32> to vector<2x128xf32>
    %24 = vector.shape_cast %21 : vector<2x128xf32> to vector<1x2x128xf32>
    tpu.vector_store %arg5[%c0_6, %c0_7, %c0_8], %24 {strides = array<i32>} : memref<1x2x128xf32, #tpu.memory_space<vmem>>, vector<1x2x128xf32>,
    return
  }
  func.func @transform_0(%arg0: i32, %arg1: i32) -> (i32, i32, i32) {
    %c0_i32 = arith.constant 0 : i32
    %c0_i32_0 = arith.constant 0 : i32
    return %arg0, %arg1, %c0_i32 : i32, i32, i32
  }
  func.func @transform_1(%arg0: i32, %arg1: i32) -> (i32, i32) {
    %c0_i32 = arith.constant 0 : i32
    %c0_i32_0 = arith.constant 0 : i32
    %c0_i32_1 = arith.constant 0 : i32
    return %c0_i32, %c0_i32_0 : i32, i32
  }
  func.func @transform_2(%arg0: i32, %arg1: i32) -> (i32, i32) {
    %c0_i32 = arith.constant 0 : i32
    %c0_i32_0 = arith.constant 0 : i32
    %c0_i32_1 = arith.constant 0 : i32
    return %c0_i32, %c0_i32_0 : i32, i32
  }
  func.func @transform_3(%arg0: i32, %arg1: i32) -> (i32, i32, i32) {
    %c0_i32 = arith.constant 0 : i32
    %c0_i32_0 = arith.constant 0 : i32
    return %arg0, %arg1, %c0_i32 : i32, i32, i32
  }
}

</mosaic_0001>

<bundles_post_ra>
// kernel: tpu_custom_call.1
= control target key start
LH: loop header
LB: loop body
LE: loop exit
PB: predicated region body
PF: predicated region fallthrough
CT: control target
= control target key end

     0   :  { %8 = vsyncpa [#allocation3], 0  ;;  %s895_s0 = inlined_call_operand.hbm [shape: f32[2,2,4], index: 0, kind: input, shape index: {}]   ;;  %s896_s1 = inlined_call_operand.vmem [shape: f32[1,128], index: 1, kind: input, shape index: {}]   ;;  %s897_s2 = inlined_call_operand.vmem [shape: f32[1,128], index: 2, kind: input, shape index: {}]   ;;  %s898_s3 = inlined_call_operand.hbm [shape: f32[2,2,128], index: 3, kind: output, shape index: {}]  }
   0x1   :  { %10 = vsyncpa [#allocation3 + $0x1], 0 }
   0x2   :  { %11 = vsyncpa [#allocation4], 0 }
   0x3   :  { %13 = vsyncpa [#allocation4 + $0x1], 0  ;;  %s692_s12 = smov 0   ;;  %s694_s13 = smov 0  }
   0x4   :  { %s696_s14 = smov 0   ;;  %s698_s15 = smov 0  }
   0x5   :  { %s700_s16 = smov 0   ;;  %s702_s17 = smov 0  }
   0x6 LB: > { %s442_s18 = sadd.s32 4294967295, %s658_s17   ;;  %s443_s19 = sadd.s32 4294967294, %s658_s17   ;;  %s658_s17 = sphi %s702_s17, %s19_s17   ;;  %s654_s16 = sphi %s700_s16, %s914_s16   ;;  %s650_s15 = sphi %s698_s15, %s913_s15   ;;  %s646_s14 = sphi %s696_s14, %s912_s14   ;;  %s642_s13 = sphi %s694_s13, %s911_s13   ;;  %s638_s12 = sphi %s692_s12, %s910_s12  }
   0x7   : > { %s31_s20 = sadd.s32 1, %s654_s16  ;;  %s40_s21 = sadd.s32 1, %s646_s14 }
   0x8   : > { %p33_p0 = scmp.ge.s32.totalorder %s31_s20, 2  ;;  %p47_p1 = scmp.ne.s32.totalorder %s646_s14, %s642_s13 }
   0x9   : > { %p48_p2 = scmp.eq.s32.totalorder %s658_s17, 0  ;;  %p53_p3 = scmp.ne.s32.totalorder %s642_s13, %s638_s12 }
   0xa   : > { %s916_s20 = smov (%p33_p0, %s31_s20), 0  ;;  %p54_p5 = scmp.eq.s32.totalorder %s442_s18, 0 }
   0xb   : > { %p733_p4 = por %p48_p2, %p47_p1  ;;  %s35_s23 = ssub.s32 %s654_s16, %s916_s20 }
   0xc   : > { %p121_p6 = scmp.eq.s32.totalorder %s442_s18, 1  ;;  %p38_p7 = scmp.eq.s32.totalorder %s35_s23, 0 }
   0xd   : > { %p739_p8 = por %p54_p5, %p53_p3  ;;  %p127_p10 = scmp.eq.s32.totalorder %s443_s19, 1 }
   0xe   : > { %p743_p9 = por %p121_p6, %p47_p1  ;;  %p477_p13 = scmp.lt.s32.totalorder %s658_s17, 2 }
   0xf   : > { %s748_s26 = scalar_select %p38_p7, %s646_s14, %s40_s21  }
  0x10   : > { %s902_s25 = scalar_select %p743_p9, 1, 0 }
  0x11   : > { %p750_p11 = por %p127_p10, %p53_p3  ;;  %s153_s28 = sand.u32 1, %s646_s14  }
  0x12   : > { %s446_s29 = sshll.u32 %s153_s28, 1  ;;  %s447_s30 = sshll.u32 %s654_s16, 5 }
  0x13   : > { %s903_s27 = scalar_select %p750_p11, 1, 0 }
  0x14   : > { %s761_s6 = scalar_lea.hbm %s895_s0, %s447_s30  ;;  %s157_s7 = scalar_lea.vmem [#allocation2], %s446_s29 }
  0x15   : > { %s165_s8 = sshll.u32 %s157_s7, 4  ;;  %p767_p0 = pnand %p477_p13, %p733_p4  ;;  %s763_s8 = int_to_ptr.vmem [resolvable:$true] %s165_s8 }
  0x16   : > { %s154_s10 = scalar_lea.sflag [#allocation3], %s153_s28  ;;  %s546_s11 = scalar_lea.hbm %s761_s6, 32 }
  0x17   : > { %p547_p3 = scmp.ne.s32.totalorder %s761_s6, %s546_s11  ;;  %p548_p5 = pneg %p767_p0 }
  0x18   : > { %s551_s21 = scalar_lea.hbm %s895_s0, 64  ;;  %p552_p4 = scmp.lt.u32.totalorder %s761_s6, %s895_s0 }
  0x19   : > { %p549_p6 = pnand %p548_p5, %p547_p3  ;;  %p553_p10 = scmp.lt.u32.totalorder %s551_s21, %s546_s11 }
  0x1a   : > { %p555_p12 = scmp.lt.u32.totalorder %s546_s11, %s761_s6 }
  0x1b   : > { %p550_p7 = pneg %p549_p6  ;;  %p554_p13 = por %p553_p10, %p552_p4 }
  0x1d   : > { %p556_p1 = por %p555_p12, %p554_p13 }
  0x1f   : > { %p557_p2 = pnand %p556_p1, %p550_p7 }
  0x21   : > { %560 = shalt.err (!%p557_p2)
}
  0x22   : > { %s561_s28 = scalar_lea.vmem %s763_s8, 32  ;;  %s660_s29 = smov [#allocation2]  }
  0x23   : > { %p562_p3 = scmp.ne.s32.totalorder %s763_s8, %s561_s28  ;;  %s566_s30 = sshll.u32 %s660_s29, 4  ;;  %s567_s30 = int_to_ptr.vmem [resolvable:$false] %s566_s30 }
  0x24   : > { %s568_s4 = scalar_lea.vmem %s567_s30, 64  ;;  %p569_p9 = scmp.lt.s32.totalorder %s763_s8, %s567_s30 }
  0x25   : > { %p564_p6 = pnand %p562_p3, %p548_p5  ;;  %p570_p4 = scmp.lt.s32.totalorder %s568_s4, %s561_s28 }
  0x27   : > { %p565_p11 = pneg %p564_p6  ;;  %p571_p10 = por %p570_p4, %p569_p9 }
  0x29   : > { %p572_p12 = pnand %p571_p10, %p565_p11 }
  0x2b   : > { %575 = shalt.err (!%p572_p12)
}
  0x2c   : > { %472 = dma.hbm_to_vmem [thread:$0]  (!%p767_p0), %s761_s6, 32, %s763_s8, %s154_s10  }
  0x2d   : > { %p905_p1 = scmp.lt.s32.totalorder %s658_s17, 3  ;;  %p906_p2 = scmp.ge.s32.totalorder %s658_s17, 1 }
  0x2f   : > { %p171_p5 = pnand %p906_p2, %p905_p1 }
  0x30   : > { %s803_s5 = sand.u32 (!%p171_p5), 1, %s642_s13  }
  0x31   : > { %174 = sbr.rel (%p171_p5) target bundleno = 292 (0x124), region = 32  ;;  %s449_s7 = sshll.u32 (!%p171_p5), %s803_s5, 1 }
  0x32   : > { %s177_s11 = scalar_lea.sflag (!%p171_p5), [#allocation3], %s803_s5  ;;  %s180_s9 = scalar_lea.vmem (!%p171_p5), [#allocation2], %s449_s7 }
  0x38   : > { %629 = dma.done.wait (%p739_p8), %s177_s11, 32  }
  0x39   : > { %631 = vsyncadd (%p739_p8), %s177_s11, 4294967264  ;;  %v661_v0 = vmov 0   ;;  %v662_v1 = vmov 2   ;;  %v203_v2 = vld [vmem:[%s180_s9] sm:$0x3]  ;;  %v663_v3 = vmov 1  }
  0x3a   : > { %537 = vset.pattern.permute.xlu0 %v661_v0  ;;  %539 = vset.pattern.permute.xlu1 %v662_v1  ;;  %v664_v4 = vmov 3   ;;  %vm221_vm0 = vcmask 261120   ;;  %vm223_vm1 = vcmask 523264   ;;  %vm225_vm2 = vcmask 785408   ;;  %v451_v10 = vld [vmem:[%s896_s1] ss:$0 sm:$0xff] }
  0x3b   : > { %206 = vperm.xlu0 %537, %v203_v2   ;;  %214 = vperm.xlu1 %539, %v203_v2   ;;  %v452_v12 = vld [vmem:[%s897_s2] ss:$0 sm:$0xff]  ;;  %v665_v26 = vmov 683565275   ;;  %v666_v28 = vmov 2475754826  }
  0x3c   : > { %v667_v31 = vmov 2131351028   ;;  %v668_v34 = vmov 2102212464   ;;  %v669_v37 = vmov 920167782  }
  0x3d   : > { %v670_v40 = vmov 1326507024   ;;  %s458_s18 = sshll.u32 %s650_s15, 5  ;;  %s202_s19 = scalar_lea.vmem [#allocation5], %s449_s7 }
  0x3e   : > { %s362_s21 = sshll.u32 %s202_s19, 4  ;;  %s846_s28 = scalar_lea.hbm %s898_s3, %s458_s18  ;;  %s848_s21 = int_to_ptr.vmem [resolvable:$true] %s362_s21 }
  0x3f   : > { %538 = vset.pattern.permute.xlu0 %v663_v3  ;;  %540 = vset.pattern.permute.xlu1 %v664_v4  ;;  %s348_s15 = scalar_lea.sflag [#allocation4], %s803_s5  ;;  %s576_s29 = scalar_lea.vmem %s848_s21, 32 }
  0x40   : > { %210 = vperm.xlu0 %538, %v203_v2   ;;  %218 = vperm.xlu1 %540, %v203_v2   ;;  %p577_p8 = scmp.ne.s32.totalorder %s848_s21, %s576_s29  ;;  %p907_p9 = scmp.ne.s32.totalorder %s902_s25, 0 }
  0x41   : > { %s671_s30 = smov [#allocation5]  }
  0x42   : > { %p578_p11 = pnand %p577_p8, %p907_p9  ;;  %s580_s4 = sshll.u32 %s671_s30, 4  ;;  %s581_s4 = int_to_ptr.vmem [resolvable:$false] %s580_s4 }
  0x43   : > { %s582_s7 = scalar_lea.vmem %s581_s4, 64  ;;  %p583_p7 = scmp.lt.s32.totalorder %s848_s21, %s581_s4 }
  0x44   : > { %541 = vset.pattern.permute.xlu0 %v664_v4  ;;  %p579_p0 = pneg %p578_p11  ;;  %p584_p13 = scmp.lt.s32.totalorder %s582_s7, %s576_s29 }
  0x46   : > { %p585_p3 = por %p584_p13, %p583_p7 }
  0x48   : > { %p586_p6 = pnand %p585_p3, %p579_p0 }
  0xba   : > { %v207_v5 = vpop.permute.xlu0 %206  ;;  %v215_v6 = vpop.permute.xlu1 %214 }
  0xbf   : > { %v211_v7 = vpop.permute.xlu0 %210  ;;  %v219_v8 = vpop.permute.xlu1 %218 }
  0xc0   : > { %v222_v9 = vsel %vm221_vm0, %v207_v5, %v211_v7 }
  0xc1   : > { %v224_v11 = vsel %vm223_vm1, %v222_v9, %v215_v6 }
  0xc2   : > { %v226_v13 = vsel %vm225_vm2, %v224_v11, %v219_v8 }
  0xc3   : > { %v234_v14 = vmul.f32 %v451_v10, %v226_v13 }
  0xc5   : > { %v819_v15 = vsub.f32 %v234_v14, %v452_v12 }
  0xc7   : > { %v246_v16 = vand.u32 2139095040, %v819_v15  ;;  %v243_v20 = vand.u32 2147483647, %v819_v15  ;;  %vm245_vm10 = vcmp.lt.s32.totalorder %v819_v15, 0  ;;  %vm335_vm15 = vweird.f32 %v819_v15 }
  0xc9   : > { %v247_v17 = vshrl.u32 %v246_v16, 23  ;;  %v250_v23 = vand.u32 8388607, %v243_v20  ;;  %vm244_vm11 = vcmp.le.f32.partialorder %v243_v20, 0.7853982 }
  0xcb   : > { %v453_v18 = vadd.s32 4294967169, %v247_v17  ;;  %v251_v42 = vor.u32 8388608, %v250_v23 }
  0xcd   : > { %v253_v19 = vadd.s32 1, %v453_v18  ;;  %v291_v56 = vshll.u32 %v251_v42, 8 }
  0xcf   : > { %vm254_vm3 = vcmp.gt.s32.totalorder %v253_v19, 0 }
  0xd0   : > { %v255_v21 = vsel %vm254_vm3, %v253_v19, 0 }
  0xd1   : > { %v257_v22 = vand.u32 31, %v255_v21  ;;  %v256_v25 = vshrl.u32 %v255_v21, 5 }
  0xd3   : > { %v258_v24 = vsub.s32 32, %v257_v22  ;;  %v260_v27 = vshll.u32 %v665_v26, %v257_v22  ;;  %v263_v29 = vshll.u32 %v666_v28, %v257_v22  ;;  %v266_v33 = vshll.u32 %v667_v31, %v257_v22 }
  0xd4   : > { %v269_v36 = vshll.u32 %v668_v34, %v257_v22  ;;  %v272_v39 = vshll.u32 %v669_v37, %v257_v22  ;;  %vm275_vm4 = vcmp.lt.s32.totalorder %v256_v25, 1  ;;  %vm278_vm5 = vcmp.lt.s32.totalorder %v256_v25, 4 }
  0xd5   : > { %v261_v30 = vshrl.u32 %v666_v28, %v258_v24  ;;  %v264_v32 = vshrl.u32 %v667_v31, %v258_v24  ;;  %v267_v35 = vshrl.u32 %v668_v34, %v258_v24  ;;  %v270_v38 = vshrl.u32 %v669_v37, %v258_v24 }
  0xd6   : > { %v273_v41 = vshrl.u32 %v670_v40, %v258_v24  ;;  %v259_v51 = vshrl.u32 %v665_v26, %v258_v24  ;;  %vm277_vm6 = vcmp.lt.s32.totalorder %v256_v25, 3  ;;  %vm276_vm7 = vcmp.lt.s32.totalorder %v256_v25, 2 }
  0xd7   : > { %v262_v43 = vor.u32 %v261_v30, %v260_v27  ;;  %v265_v44 = vor.u32 %v264_v32, %v263_v29  ;;  %v268_v45 = vor.u32 %v267_v35, %v266_v33  ;;  %v271_v46 = vor.u32 %v270_v38, %v269_v36 }
  0xd8   : > { %v274_v47 = vor.u32 %v273_v41, %v272_v39 }
  0xd9   : > { %v280_v48 = vsel %vm278_vm5, %v268_v45, 2102212464  ;;  %v283_v49 = vsel %vm275_vm4, %v262_v43, %v265_v44  ;;  %v287_v50 = vsel %vm275_vm4, %v265_v44, %v268_v45  ;;  %v284_v52 = vsel %vm278_vm5, %v271_v46, 920167782 }
  0xda   : > { %v288_v53 = vsel %vm278_vm5, %v274_v47, 1326507024  ;;  %v285_v54 = vsel %vm277_vm6, %v268_v45, %v284_v52  ;;  %v279_v57 = vsel %vm275_vm4, %v259_v51, %v262_v43  ;;  %v281_v58 = vsel %vm277_vm6, %v265_v44, %v280_v48 }
  0xdb   : > { %v289_v55 = vsel %vm277_vm6, %v271_v46, %v288_v53  ;;  %v286_v59 = vsel %vm276_vm7, %v283_v49, %v285_v54  ;;  %v282_v1 = vsel %vm276_vm7, %v279_v57, %v281_v58 }
  0xdc   : > { %v290_v60 = vsel %vm276_vm7, %v287_v50, %v289_v55  ;;  %v828_v63 = vmul.u32.u64.low %v291_v56, %v286_v59  ;;  %v829_v0 = vmul.u32.u64.high %v291_v56, %v286_v59, %v828_v63  ;;  %v298_v3 = vmul.u32 %v291_v56, %v282_v1 }
  0xdd   : > { %v825_v61 = vmul.u32.u64.low %v291_v56, %v290_v60  ;;  %v826_v62 = vmul.u32.u64.high %v291_v56, %v290_v60, %v825_v61 }
  0xde   : > { %v301_v2 = vadd.s32 1, %v829_v0 }
  0xdf   : > { %vm300_vm8 = vc.u32 %v826_v62, %v828_v63  ;;  %v299_v16 = vadd.s32 %v828_v63, %v826_v62 }
  0xe0   : > { %v302_v4 = vsel %vm300_vm8, %v301_v2, %v829_v0 }
  0xe1   : > { %v303_v5 = vadd.s32 %v302_v4, %v298_v3 }
  0xe3   : > { %v304_v6 = vadd.s32 536870912, %v303_v5 }
  0xe5   : > { %v305_v7 = vshrl.u32 %v304_v6, 30 }
  0xe7   : > { %v306_v8 = vshll.u32 %v305_v7, 30  ;;  %v329_v31 = vsub.s32 4, %v305_v7 }
  0xe9   : > { %v307_v9 = vsub.s32 %v303_v5, %v306_v8  ;;  %v330_v33 = vsel %vm245_vm10, %v329_v31, %v305_v7 }
  0xea   : > { %v332_v34 = vsel %vm244_vm11, 0, %v330_v33 }
  0xeb   : > { %v309_v10 = vsub.s32 0, %v307_v9  ;;  %v336_v35 = vand.u32 3, %v332_v34 }
  0xed   : > { %v454_v11 = vmin.u32 %v309_v10, %v307_v9  ;;  %vm341_vm12 = vcmp.eq.s32.totalorder %v336_v35, 2  ;;  %vm338_vm13 = vcmp.eq.s32.totalorder %v336_v35, 0  ;;  %vm337_vm14 = vcmp.lt.s32.totalorder %v336_v35, 2 }
  0xef   : > { %v311_v12 = vclz %v454_v11 }
  0xf1   : > { %v455_v13 = vadd.s32 4294967294, %v311_v12 }
  0xf3   : > { %vm456_vm9 = vcmp.lt.s32.totalorder %v455_v13, 0 }
  0xf4   : > { %v314_v14 = vsel %vm456_vm9, 0, %v455_v13 }
  0xf5   : > { %v315_v17 = vsub.s32 32, %v314_v14  ;;  %v319_v18 = vsub.s32 4294967266, %v314_v14  ;;  %v316_v19 = vshll.u32 %v307_v9, %v314_v14 }
  0xf7   : > { %v317_v21 = vshrl.u32 %v299_v16, %v315_v17  ;;  %v320_v22 = vadd.s32 127, %v319_v18 }
  0xf9   : > { %v318_v23 = vor.u32 %v317_v21, %v316_v19  ;;  %v321_v24 = vshll.u32 %v320_v22, 23 }
  0xfb   : > { %v322_v25 = vor.u32 4788187, %v321_v24  ;;  %v325_v27 = vcvt.s32.f32 %v318_v23 }
  0xfd   : > { %v323_v26 = vand.u32 2147483647, %v322_v25 }
  0xff   : > { %v326_v28 = vmul.f32 %v325_v27, %v323_v26 }
 0x101   : > { %v327_v29 = vxor.u32 2147483648, %v326_v28 }
 0x103   : > { %v328_v30 = vsel %vm245_vm10, %v327_v29, %v326_v28 }
 0x104   : > { %v331_v32 = vsel %vm244_vm11, %v819_v15, %v328_v30 }
 0x105   : > { %542 = vcosq.f32 %v331_v32 }
 0x106   : > { %544 = vsinq.f32 %v331_v32 }
 0x10f   : > { %v543_v36 = vpop.eup %542 }
 0x110   : > { %v545_v37 = vpop.eup %544  ;;  %v342_v38 = vxor.u32 2147483648, %v543_v36 }
 0x111   : > { %v339_v39 = vxor.u32 2147483648, %v545_v37 }
 0x112   : > { %v343_v20 = vsel %vm341_vm12, %v342_v38, %v545_v37 }
 0x113   : > { %v340_v40 = vsel %vm338_vm13, %v543_v36, %v339_v39 }
 0x114   : > { %v344_v41 = vsel %vm337_vm14, %v340_v40, %v343_v20 }
 0x115   : > { %v345_v42 = vsel %vm335_vm15, nan, %v344_v41 }
 0x116   : > { %346 = vst [vmem:[%s202_s19] sm:$0x3] %v345_v42 }
 0x117   : > { %589 = shalt.err (!%p586_p6)
}
 0x118   : > { %s590_s5 = scalar_lea.hbm %s846_s28, 32  ;;  %s594_s24 = scalar_lea.hbm %s898_s3, 64 }
 0x119   : > { %p591_p4 = scmp.ne.s32.totalorder %s846_s28, %s590_s5  ;;  %p595_p1 = scmp.lt.u32.totalorder %s846_s28, %s898_s3 }
 0x11a   : > { %p596_p2 = scmp.lt.u32.totalorder %s594_s24, %s590_s5  ;;  %p598_p8 = scmp.lt.u32.totalorder %s590_s5, %s846_s28 }
 0x11b   : > { %p592_p10 = pnand %p591_p4, %p907_p9 }
 0x11c   : > { %p597_p5 = por %p596_p2, %p595_p1 }
 0x11d   : > { %p593_p12 = pneg %p592_p10 }
 0x11e   : > { %p599_p11 = por %p598_p8, %p597_p5 }
 0x120   : > { %p600_p0 = pnand %p599_p11, %p593_p12 }
 0x122   : > { %603 = shalt.err (!%p600_p0)
}
 0x123   : > { %467 = dma.vmem_to_hbm [thread:$0]  (%p907_p9), %s848_s21, 32, %s846_s28, %s348_s15  }
 0x124 PF: > { %s374_s10 = sand.u32 1, %s638_s12   ;;  %p908_p7 = scmp.ne.s32.totalorder %s903_s27, 0 }
 0x125   : > { %p909_p13 = scmp.ge.s32.totalorder %s658_s17, 2  ;;  %s375_s18 = scalar_lea.sflag [#allocation4], %s374_s10 }
 0x127   : > { %p474_p3 = pnand %p909_p13, %p908_p7 }
 0x129   : > { %633 = dma.done.wait (!%p474_p3), %s375_s18, 32  }
 0x12a   : > { %635 = vsyncadd (!%p474_p3), %s375_s18, 4294967264  ;;  %s19_s17 = sadd.s32 1, %s658_s17   ;;  %s910_s12 = smov %s642_s13 }
 0x12b   : > { %p16_p6 = scmp.ge.s32.totalorder %s19_s17, 4   ;;  %s911_s13 = smov %s646_s14 }
 0x12c   : > { %s912_s14 = smov %s748_s26  ;;  %s913_s15 = smov %s654_s16 }
 0x12d   : > { %s914_s16 = smov %s916_s20  ;;  %18 = sbr.rel (!%p16_p6) target bundleno = 6 (0x6), region = 77 }
 0x134   :  { %380 = vsyncpa [#allocation3], 1 }
 0x135   :  { %382 = vsyncpa [#allocation3 + $0x1], 1 }
 0x136   :  { %383 = vsyncpa [#allocation4], 1 }
 0x137   :  { %385 = vsyncpa [#allocation4 + $0x1], 1 }

</bundles_post_ra>
